<compile_context>
chip_gen: v7x
topology: tpu7x:2x2x1
jax: 0.10.0
libtpu: 0.0.40
codegen_flags: <defaults>
</compile_context>

<pallas_src>
import functools

import jax
import jax.numpy as jnp
from jax import lax
from jax.experimental import pallas as pl
from jax.experimental.pallas import tpu as pltpu

STATE_SIZE = 4
ACTION_SIZE = 2
HIDDEN_SIZE = 64
OUT_SUB = 8                  # fc3 output padded to 8 sublanes (actions live on sublanes 0..1)
DEFAULT_BLOCK_BATCH = 2048   # rows per grid step (review: raise from 512)
SPLIT_MIN_BATCH = 1024       # above this, force >=2 grid steps so v7x's 2nd TC gets work


def _round_up(n, m):
    return ((n + m - 1) // m) * m


def _choose_tile(batch, block_batch):
    """Pick (row_tile, padded_batch).

    Multi-step tiles are 128-aligned so every BlockSpec dim satisfies the (8,128)
    divisibility rule; a single-step tile only needs 8-alignment because the block
    then equals the full (padded) array.
    """
    bb = max(128, _round_up(block_batch, 128))
    if batch > bb:
        tb = bb
    elif batch >= SPLIT_MIN_BATCH:
        tb = _round_up((batch + 1) // 2, 128)   # exactly 2 steps -> both v7x TCs busy
    else:
        tb = max(8, _round_up(batch, 8))        # single step
    return tb, _round_up(batch, tb)


def _in_specs(tb):
    # Weights/biases use a constant index_map -> stay VMEM-resident across the whole
    # grid (no re-DMA); only the x rows and the output are streamed per step.
    resident = lambda i: (0, 0)
    return [
        pl.BlockSpec((tb, STATE_SIZE), lambda i: (i, 0)),        # x rows
        pl.BlockSpec((STATE_SIZE, HIDDEN_SIZE), resident),       # w1
        pl.BlockSpec((1, HIDDEN_SIZE), resident),                # b1 (f32)
        pl.BlockSpec((HIDDEN_SIZE, HIDDEN_SIZE), resident),      # w2
        pl.BlockSpec((1, HIDDEN_SIZE), resident),                # b2 (f32)
        pl.BlockSpec((OUT_SUB, HIDDEN_SIZE), resident),          # w3t (transposed, padded)
        pl.BlockSpec((OUT_SUB, 1), resident),                    # b3t (transposed, padded, f32)
    ]


def _qvals_t(x_ref, w1_ref, b1_ref, w2_ref, b2_ref, w3t_ref, b3t_ref):
    """Q-values, transposed: (OUT_SUB, tb) f32 — actions on sublanes, batch on lanes."""
    cd = w1_ref.dtype  # MXU compute dtype (bf16 on the fast path, f32 on the exact path)
    # fc1 + relu (bias/relu ride the VPU in f32 while the MXU FIFO drains)
    h1 = jnp.dot(x_ref[...].astype(cd), w1_ref[...], preferred_element_type=jnp.float32)
    h1 = jnp.maximum(h1 + b1_ref[...], 0.0)
    # fc2 + relu
    h2 = jnp.dot(h1.astype(cd), w2_ref[...], preferred_element_type=jnp.float32)
    h2 = jnp.maximum(h2 + b2_ref[...], 0.0)
    # fc3, transposed result: contract the feature dims of w3t (OUT_SUB, H) and
    # h2 (tb, H) -> (OUT_SUB, tb). Only 8 lane-dense sublanes ever hit HBM instead
    # of a 128-lane-padded (tb, 128) slab.
    qt = lax.dot_general(w3t_ref[...], h2.astype(cd),
                         dimension_numbers=(((1,), (1,)), ((), ())),
                         preferred_element_type=jnp.float32)
    return qt + b3t_ref[...]


def qvals_kernel(x_ref, w1_ref, b1_ref, w2_ref, b2_ref, w3t_ref, b3t_ref, out_ref):
    out_ref[...] = _qvals_t(x_ref, w1_ref, b1_ref, w2_ref, b2_ref,
                            w3t_ref, b3t_ref).astype(out_ref.dtype)


def greedy_kernel(x_ref, w1_ref, b1_ref, w2_ref, b2_ref, w3t_ref, b3t_ref,
                  maxq_ref, act_ref):
    qt = _qvals_t(x_ref, w1_ref, b1_ref, w2_ref, b2_ref, w3t_ref, b3t_ref)
    best_q = qt[0:1, :]
    best_a = jnp.zeros_like(best_q, dtype=jnp.int32)
    for a in range(1, ACTION_SIZE):          # static unroll over the 2 actions
        qa = qt[a:a + 1, :]
        take = qa > best_q                   # strict '>' matches torch argmax tie-break
        best_a = jnp.where(take, a, best_a)
        best_q = jnp.where(take, qa, best_q)
    maxq_ref[...] = best_q
    act_ref[...] = best_a


# TODO(synk): verify in an xprof trace that plain ("parallel",) shards the batch axis
# across both v7x TensorCores; if not, switch to pltpu.CORE_PARALLEL / pl.core_map.
_COMPILER_PARAMS = pltpu.CompilerParams(dimension_semantics=("parallel",))


@functools.partial(jax.jit, static_argnames=("block_batch",))
def qnetwork_forward(x, kparams, *, block_batch=DEFAULT_BLOCK_BATCH):
    """Batched Q-network forward. x: (B, 4) f32 -> (B, 2) f32 Q-values."""
    w1, b1, w2, b2, w3t, b3t = kparams
    batch = x.shape[0]
    if batch == 0:
        return jnp.zeros((0, ACTION_SIZE), jnp.float32)

    tb, padded_batch = _choose_tile(batch, block_batch)
    if padded_batch != batch:
        x = jnp.pad(x, ((0, padded_batch - batch), (0, 0)))
    grid = (padded_batch // tb,)

    out_t = pl.pallas_call(
        qvals_kernel,
        out_shape=jax.ShapeDtypeStruct((OUT_SUB, padded_batch), jnp.float32),
        grid_spec=pltpu.PrefetchScalarGridSpec(
            num_scalar_prefetch=0,
            grid=grid,
            in_specs=_in_specs(tb),
            out_specs=pl.BlockSpec((OUT_SUB, tb), lambda i: (0, i)),
        ),
        compiler_params=_COMPILER_PARAMS,
    )(x, w1, b1, w2, b2, w3t, b3t)

    return out_t[:ACTION_SIZE, :batch].T


@functools.partial(jax.jit, static_argnames=("block_batch",))
def qnetwork_greedy(x, kparams, *, block_batch=DEFAULT_BLOCK_BATCH):
    """Fused DQN action selection: returns (max_q (B,) f32, action (B,) int32)."""
    w1, b1, w2, b2, w3t, b3t = kparams
    batch = x.shape[0]
    if batch == 0:
        return jnp.zeros((0,), jnp.float32), jnp.zeros((0,), jnp.int32)

    tb, padded_batch = _choose_tile(batch, block_batch)
    if padded_batch != batch:
        x = jnp.pad(x, ((0, padded_batch - batch), (0, 0)))
    grid = (padded_batch // tb,)

    maxq, act = pl.pallas_call(
        greedy_kernel,
        out_shape=(jax.ShapeDtypeStruct((1, padded_batch), jnp.float32),
                   jax.ShapeDtypeStruct((1, padded_batch), jnp.int32)),
        grid_spec=pltpu.PrefetchScalarGridSpec(
            num_scalar_prefetch=0,
            grid=grid,
            in_specs=_in_specs(tb),
            out_specs=(pl.BlockSpec((1, tb), lambda i: (0, i)),
                       pl.BlockSpec((1, tb), lambda i: (0, i))),
        ),
        compiler_params=_COMPILER_PARAMS,
    )(x, w1, b1, w2, b2, w3t, b3t)

    return maxq[0, :batch], act[0, :batch]


def init_params(key):
    """PyTorch-Linear-style init U[-1/sqrt(fan_in), 1/sqrt(fan_in)].

    Math layout (transposed vs torch): w (in_features, out_features), b (1, out).
    """
    def linear(k, fan_in, fan_out):
        kw, kb = jax.random.split(k)
        bound = 1.0 / jnp.sqrt(jnp.float32(fan_in))
        w = jax.random.uniform(kw, (fan_in, fan_out), jnp.float32, -bound, bound)
        b = jax.random.uniform(kb, (1, fan_out), jnp.float32, -bound, bound)
        return w, b

    k1, k2, k3 = jax.random.split(key, 3)
    w1, b1 = linear(k1, STATE_SIZE, HIDDEN_SIZE)
    w2, b2 = linear(k2, HIDDEN_SIZE, HIDDEN_SIZE)
    w3, b3 = linear(k3, HIDDEN_SIZE, ACTION_SIZE)
    return (w1, b1, w2, b2, w3, b3)


def prepare_params(params, compute_dtype=jnp.bfloat16):
    """One-time kernel-layout prep (kept OUT of the per-call jitted wrapper):
      * w1/w2 cast to the MXU compute dtype (bf16 fast path, f32 exact path),
      * fc3 stored transposed + sublane-padded: w3t (OUT_SUB, HIDDEN), b3t (OUT_SUB, 1),
      * biases stay f32 (the bias+relu epilogue runs in f32 vregs).
    """
    w1, b1, w2, b2, w3, b3 = params
    w3t = jnp.zeros((OUT_SUB, HIDDEN_SIZE), compute_dtype)
    w3t = w3t.at[:ACTION_SIZE, :].set(w3.T.astype(compute_dtype))
    b3t = jnp.zeros((OUT_SUB, 1), jnp.float32).at[:ACTION_SIZE, :].set(b3.T)
    return (w1.astype(compute_dtype), b1.astype(jnp.float32),
            w2.astype(compute_dtype), b2.astype(jnp.float32),
            w3t, b3t)


def qnetwork_reference(x, params):
    w1, b1, w2, b2, w3, b3 = params
    h1 = jnp.maximum(x @ w1 + b1, 0.0)
    h2 = jnp.maximum(h1 @ w2 + b2, 0.0)
    return h2 @ w3 + b3


if __name__ == "__main__":
    key = jax.random.PRNGKey(0)
    k_params, k_x = jax.random.split(key)
    params = init_params(k_params)

    kparams_f32 = prepare_params(params, compute_dtype=jnp.float32)    # exact path
    kparams_bf16 = prepare_params(params, compute_dtype=jnp.bfloat16)  # fast MXU path

    # Small, module-consistent example: batch of 8 CartPole states (4 features each).
    batch = 8
    x = jax.random.normal(k_x, (batch, STATE_SIZE), jnp.float32)
    ref = qnetwork_reference(x, params)

    out_f32 = jax.block_until_ready(qnetwork_forward(x, kparams_f32))
    assert out_f32.shape == (batch, ACTION_SIZE)
    assert jnp.allclose(out_f32, ref, atol=1e-5, rtol=1e-5), "f32 path mismatch vs reference"

    out_bf16 = jax.block_until_ready(qnetwork_forward(x, kparams_bf16))
    assert out_bf16.shape == (batch, ACTION_SIZE)
    assert jnp.allclose(out_bf16, ref, atol=3e-2, rtol=3e-2), "bf16 path mismatch vs reference"

    # Multi-step grid + batch-padding path (replay-batch style, 128-aligned tiles).
    x2 = jax.random.normal(jax.random.PRNGKey(1), (300, STATE_SIZE), jnp.float32)
    ref2 = qnetwork_reference(x2, params)
    out2 = jax.block_until_ready(qnetwork_forward(x2, kparams_f32, block_batch=128))
    assert out2.shape == (300, ACTION_SIZE)
    assert jnp.allclose(out2, ref2, atol=1e-5, rtol=1e-5), "tiled path mismatch vs reference"

    # Fused greedy-action variant (DQN act()/TD-target path: no Q-slab HBM round trip).
    maxq, act = qnetwork_greedy(x, kparams_f32)
    jax.block_until_ready((maxq, act))
    assert maxq.shape == (batch,) and act.shape == (batch,)
    assert jnp.allclose(maxq, ref.max(axis=-1), atol=1e-5, rtol=1e-5), "fused max mismatch"
    assert jnp.array_equal(act, jnp.argmax(ref, axis=-1).astype(jnp.int32)), "fused argmax mismatch"

    print("KERNEL_OK")
</pallas_src>

<mosaic_0001>
module attributes {stable_mosaic.version = 11 : i64} {
  func.func @qvals_kernel(%arg0: i32, %arg1: memref<8x4xf32, #tpu.memory_space<vmem>>, %arg2: memref<4x64xf32, #tpu.memory_space<vmem>>, %arg3: memref<1x64xf32, #tpu.memory_space<vmem>>, %arg4: memref<64x64xf32, #tpu.memory_space<vmem>>, %arg5: memref<1x64xf32, #tpu.memory_space<vmem>>, %arg6: memref<8x64xf32, #tpu.memory_space<vmem>>, %arg7: memref<8x1xf32, #tpu.memory_space<vmem>>, %arg8: memref<8x8xf32, #tpu.memory_space<vmem>>) attributes {dimension_semantics = [#tpu.dimension_semantics<parallel>], iteration_bounds = array<i64: 1>, scalar_prefetch = 0 : i64, scratch_operands = 0 : i64, tpu.core_type = #tpu.core_type<tc>, window_params = [{transform_indices = @transform_0, window_bounds = array<i64: 8, 4>}, {pipeline_mode = #tpu.pipeline_mode<synchronous>, transform_indices = @transform_1, window_bounds = array<i64: 4, 64>}, {pipeline_mode = #tpu.pipeline_mode<synchronous>, transform_indices = @transform_2, window_bounds = array<i64: 1, 64>}, {pipeline_mode = #tpu.pipeline_mode<synchronous>, transform_indices = @transform_3, window_bounds = array<i64: 64, 64>}, {pipeline_mode = #tpu.pipeline_mode<synchronous>, transform_indices = @transform_4, window_bounds = array<i64: 1, 64>}, {pipeline_mode = #tpu.pipeline_mode<synchronous>, transform_indices = @transform_5, window_bounds = array<i64: 8, 64>}, {pipeline_mode = #tpu.pipeline_mode<synchronous>, transform_indices = @transform_6, window_bounds = array<i64: 8, 1>}, {transform_indices = @transform_7, window_bounds = array<i64: 8, 8>}]} {
    %c0 = arith.constant 0 : index
    %c0_0 = arith.constant 0 : index
    %0 = vector.load %arg1[%c0, %c0_0] : memref<8x4xf32, #tpu.memory_space<vmem>>, vector<8x4xf32>
    %c0_1 = arith.constant 0 : index
    %c0_2 = arith.constant 0 : index
    %1 = vector.load %arg2[%c0_1, %c0_2] : memref<4x64xf32, #tpu.memory_space<vmem>>, vector<4x64xf32>
    %cst = arith.constant dense<0.000000e+00> : vector<8x64xf32>
    %2 = tpu.matmul %0, %1, %cst {dimension_numbers = #tpu.dot_dimension_numbers<[1], [0], [0], [1], [0, 0, 1, 1], [], []>} : vector<8x4xf32>, vector<4x64xf32>, vector<8x64xf32> -> vector<8x64xf32>
    %c0_3 = arith.constant 0 : index
    %c0_4 = arith.constant 0 : index
    %3 = vector.load %arg3[%c0_3, %c0_4] : memref<1x64xf32, #tpu.memory_space<vmem>>, vector<1x64xf32>
    %4 = vector.broadcast %3 : vector<1x64xf32> to vector<8x64xf32>
    %5 = arith.addf %2, %4 : vector<8x64xf32>
    %cst_5 = arith.constant 0.000000e+00 : f32
    %6 = vector.broadcast %cst_5 : f32 to vector<8x64xf32>
    %7 = arith.maximumf %5, %6 : vector<8x64xf32>
    %c0_6 = arith.constant 0 : index
    %c0_7 = arith.constant 0 : index
    %8 = vector.load %arg4[%c0_6, %c0_7] : memref<64x64xf32, #tpu.memory_space<vmem>>, vector<64x64xf32>
    %cst_8 = arith.constant dense<0.000000e+00> : vector<8x64xf32>
    %9 = tpu.matmul %7, %8, %cst_8 {dimension_numbers = #tpu.dot_dimension_numbers<[1], [0], [0], [1], [0, 0, 1, 1], [], []>} : vector<8x64xf32>, vector<64x64xf32>, vector<8x64xf32> -> vector<8x64xf32>
    %c0_9 = arith.constant 0 : index
    %c0_10 = arith.constant 0 : index
    %10 = vector.load %arg5[%c0_9, %c0_10] : memref<1x64xf32, #tpu.memory_space<vmem>>, vector<1x64xf32>
    %11 = vector.broadcast %10 : vector<1x64xf32> to vector<8x64xf32>
    %12 = arith.addf %9, %11 : vector<8x64xf32>
    %cst_11 = arith.constant 0.000000e+00 : f32
    %13 = vector.broadcast %cst_11 : f32 to vector<8x64xf32>
    %14 = arith.maximumf %12, %13 : vector<8x64xf32>
    %c0_12 = arith.constant 0 : index
    %c0_13 = arith.constant 0 : index
    %15 = vector.load %arg6[%c0_12, %c0_13] : memref<8x64xf32, #tpu.memory_space<vmem>>, vector<8x64xf32>
    %cst_14 = arith.constant dense<0.000000e+00> : vector<8x8xf32>
    %16 = tpu.matmul %15, %14, %cst_14 {dimension_numbers = #tpu.dot_dimension_numbers<[1], [1], [0], [0], [0, 0, 1, 0], [], []>} : vector<8x64xf32>, vector<8x64xf32>, vector<8x8xf32> -> vector<8x8xf32>
    %c0_15 = arith.constant 0 : index
    %c0_16 = arith.constant 0 : index
    %17 = vector.load %arg7[%c0_15, %c0_16] : memref<8x1xf32, #tpu.memory_space<vmem>>, vector<8x1xf32>
    %18 = vector.broadcast %17 : vector<8x1xf32> to vector<8x8xf32>
    %19 = arith.addf %16, %18 : vector<8x8xf32>
    %c0_17 = arith.constant 0 : index
    %c0_18 = arith.constant 0 : index
    %20 = vector.load %arg8[%c0_17, %c0_18] : memref<8x8xf32, #tpu.memory_space<vmem>>, vector<8x8xf32>
    tpu.vector_store %arg8[%c0_17, %c0_18], %19 {strides = array<i32>} : memref<8x8xf32, #tpu.memory_space<vmem>>, vector<8x8xf32>,
    return
  }
  func.func @transform_0(%arg0: i32) -> (i32, i32) {
    %c0_i32 = arith.constant 0 : i32
    %c0_i32_0 = arith.constant 0 : i32
    return %arg0, %c0_i32 : i32, i32
  }
  func.func @transform_1(%arg0: i32) -> (i32, i32) {
    %c0_i32 = arith.constant 0 : i32
    %c0_i32_0 = arith.constant 0 : i32
    %c0_i32_1 = arith.constant 0 : i32
    return %c0_i32, %c0_i32_0 : i32, i32
  }
  func.func @transform_2(%arg0: i32) -> (i32, i32) {
    %c0_i32 = arith.constant 0 : i32
    %c0_i32_0 = arith.constant 0 : i32
    %c0_i32_1 = arith.constant 0 : i32
    return %c0_i32, %c0_i32_0 : i32, i32
  }
  func.func @transform_3(%arg0: i32) -> (i32, i32) {
    %c0_i32 = arith.constant 0 : i32
    %c0_i32_0 = arith.constant 0 : i32
    %c0_i32_1 = arith.constant 0 : i32
    return %c0_i32, %c0_i32_0 : i32, i32
  }
  func.func @transform_4(%arg0: i32) -> (i32, i32) {
    %c0_i32 = arith.constant 0 : i32
    %c0_i32_0 = arith.constant 0 : i32
    %c0_i32_1 = arith.constant 0 : i32
    return %c0_i32, %c0_i32_0 : i32, i32
  }
  func.func @transform_5(%arg0: i32) -> (i32, i32) {
    %c0_i32 = arith.constant 0 : i32
    %c0_i32_0 = arith.constant 0 : i32
    %c0_i32_1 = arith.constant 0 : i32
    return %c0_i32, %c0_i32_0 : i32, i32
  }
  func.func @transform_6(%arg0: i32) -> (i32, i32) {
    %c0_i32 = arith.constant 0 : i32
    %c0_i32_0 = arith.constant 0 : i32
    %c0_i32_1 = arith.constant 0 : i32
    return %c0_i32, %c0_i32_0 : i32, i32
  }
  func.func @transform_7(%arg0: i32) -> (i32, i32) {
    %c0_i32 = arith.constant 0 : i32
    %c0_i32_0 = arith.constant 0 : i32
    return %c0_i32, %arg0 : i32, i32
  }
}

</mosaic_0001>

<bundles_post_ra>
// kernel: qnetwork_forward.1
= control target key start
LH: loop header
LB: loop body
LE: loop exit
PB: predicated region body
PF: predicated region fallthrough
CT: control target
= control target key end

     0   :  { %12 = vsyncpa [#allocation3], 0  ;;  %s401_s24 = smov [#allocation2]   ;;  %s484_s0 = inlined_call_operand.vmem [shape: f32[8,4], index: 0, kind: input, shape index: {}]   ;;  %s485_s1 = inlined_call_operand.vmem [shape: f32[4,64], index: 1, kind: input, shape index: {}]   ;;  %s486_s2 = inlined_call_operand.vmem [shape: f32[1,64], index: 2, kind: input, shape index: {}]   ;;  %s487_s3 = inlined_call_operand.hbm [shape: f32[64,64], index: 3, kind: input, shape index: {}]   ;;  %s488_s4 = inlined_call_operand.vmem [shape: f32[1,64], index: 4, kind: input, shape index: {}]   ;;  %s489_s5 = inlined_call_operand.vmem [shape: f32[8,64], index: 5, kind: input, shape index: {}]   ;;  %s490_s6 = inlined_call_operand.vmem [shape: f32[8,1], index: 6, kind: input, shape index: {}]   ;;  %s491_s7 = inlined_call_operand.vmem [shape: f32[8,8], index: 7, kind: output, shape index: {}]  }
   0x1   :  { %s24_s25 = sshll.u32 %s401_s24, 4  ;;  %s377_s28 = scalar_lea.hbm %s487_s3, 1024  ;;  %s25_s25 = int_to_ptr.vmem [resolvable:$true] %s24_s25 }
   0x2   :  { %p378_p0 = scmp.ne.s32.totalorder %s487_s3, %s377_s28  ;;  %p381_p1 = scmp.lt.u32.totalorder %s377_s28, %s487_s3 }
   0x4   :  { %p383_p2 = pnand %p381_p1, %p378_p0 }
   0x6   :  { %386 = shalt.err (!%p383_p2)
}
   0x7   :  { %s387_s10 = scalar_lea.vmem %s25_s25, 1024  ;;  %p392_p4 = scmp.lt.s32.totalorder %s25_s25, %s25_s25 }
   0x8   :  { %p388_p3 = scmp.ne.s32.totalorder %s25_s25, %s387_s10  ;;  %p393_p5 = scmp.lt.s32.totalorder %s387_s10, %s387_s10 }
   0xa   :  { %p394_p6 = por %p393_p5, %p392_p4 }
   0xc   :  { %p395_p7 = pnand %p394_p6, %p388_p3 }
   0xe   :  { %398 = shalt.err (!%p395_p7)
}
   0xf   :  { %s402_s11 = smov 128   ;;  %s403_s12 = smov 8  }
  0x10   :  { %30 = dma.hbm_to_vmem [thread:$0]  %s487_s3, 1024, %s25_s25, [#allocation3], %s402_s11, %s402_s11, %s403_s12  }
  0x11   :  { %399 = dma.done.wait [#allocation3], 1024  }
  0x12   :  { %400 = vsyncadd [#allocation3], 4294966272  ;;  %v404_v0 = vmov 0.0   ;;  %vm405_vm0 = vmmov 0   ;;  %v406_v1 = vmov 0.0|0.0   ;;  %vm53_vm1 = vcmask 1043456  }
  0x13   :  { %328 = vmatprep.subr.mxu0 %v404_v0  ;;  %330 = vmatprep.mubr.msk.f32.mxu0 %vm405_vm0, %v404_v0  ;;  %vm49_vm2 = vcmask 31744   ;;  %v41_v2 = vld [vmem:[%s485_s1] sm:$0xf]  ;;  %v129_v5 = vld [vmem:[#allocation2 + $0x8] sm:$0xff]  ;;  %v130_v6 = vld [vmem:[#allocation2 + $0x10] sm:$0xff]  ;;  %vm143_vm3 = vcmask 523264  }
  0x14   :  { %357 = vmatprep.subr.bf16.mxu1 %v406_v1  ;;  %349 = vmatprep.mubr.msk.f32.mxu1 %vm405_vm0, %v404_v0  ;;  %v40_v3 = vld [vmem:[%s484_s0] sm:$0xff]  ;;  %v131_v7 = vld [vmem:[#allocation2 + $0x18] sm:$0xff]  ;;  %v133_v11 = vld [vmem:[#allocation2 + $0x28] sm:$0xff]  ;;  %v407_v22 = vmov 0   ;;  %vm301_vm4 = vcmask 64512  }
  0x15   :  { %v128_v4 = vld [vmem:[#allocation2] sm:$0xff]  ;;  %329 = vmatpush3.msk.msra.mxu0 %vm53_vm1, %v41_v2  ;;  %v361_v9 = vpack.c.bf16 %v131_v7, %v130_v6  ;;  %v134_v13 = vld [vmem:[#allocation2 + $0x30] sm:$0xff]  ;;  %v135_v14 = vld [vmem:[#allocation2 + $0x38] sm:$0xff]  ;;  %376 = vset.pattern.permute.xlu0 %v407_v22 }
  0x16   :  { %331 = vmatmul.mubr.msk.f32.vlgmr.msra.gmra.mrb[0].mxu0 %vm49_vm2, %v40_v3  ;;  %v358_v8 = vpack.c.bf16 %v129_v5, %v128_v4  ;;  %352 = vmatprep.subr.mxu0 %v404_v0  ;;  %v132_v10 = vld [vmem:[#allocation2 + $0x20] sm:$0xff]  ;;  %v367_v15 = vpack.c.bf16 %v135_v14, %v134_v13 }
  0x17   :  { %354 = vmatprep.mubr.msk.f32.mxu0 %vm405_vm0, %v404_v0  ;;  %v364_v12 = vpack.c.bf16 %v133_v11, %v132_v10  ;;  %v308_v16 = vld [vmem:[%s486_s2] ss:$0 sm:$0xff] }
  0x18   :  { %359 = vmatpush3.bf16.msra.mxu1 %v358_v8  ;;  %v219_v21 = vld [vmem:[%s490_s6] sm:$0xff] }
  0x19   :  { %360 = vmatprep.subr.bf16.mxu1 %v406_v1  ;;  %222 = vperm.xlu0 %376, %v219_v21   ;;  %v311_v23 = vld [vmem:[%s488_s4] ss:$0 sm:$0xff] }
  0x1a   :  { %v218_v28 = vld [vmem:[%s489_s5] sm:$0xff] }
  0x1c   :  { %362 = vmatpush3.bf16.msra.mxu1 %v361_v9 }
  0x1d   :  { %363 = vmatprep.subr.bf16.mxu1 %v406_v1 }
  0x20   :  { %365 = vmatpush3.bf16.msra.mxu1 %v364_v12 }
  0x21   :  { %366 = vmatprep.subr.bf16.mxu1 %v406_v1 }
  0x24   :  { %368 = vmatpush3.bf16.msra.mxu1 %v367_v15 }
  0x98   :  { %v223_v29 = vpop.permute.xlu0 %222 }
  0xe9   :  { %v123_v17 = vpop.f32.mrb[0].mxu0 }
  0xea   :  { %v124_v18 = vadd.f32 %v308_v16, %v123_v17  ;;  %v332_v19 = vpop.f32.mrb[1].mxu0 }
  0xec   :  { %v127_v20 = vmax.f32 %v124_v18, 0.0 }
  0xee   :  { %350 = vmatmul.mubr.msk.f32.vlgmr.msra.gmra.mrb[0].mxu1 %vm143_vm3, %v127_v20 }
 0x1c1   :  { %v213_v24 = vpop.f32.mrb[0].mxu1 }
 0x1c2   :  { %v214_v25 = vadd.f32 %v311_v23, %v213_v24  ;;  %v351_v26 = vpop.f32.mrb[1].mxu1 }
 0x1c4   :  { %v217_v27 = vmax.f32 %v214_v25, 0.0 }
 0x1c6   :  { %353 = vmatpush3.xpose.msk.msra.mxu0 %vm143_vm3, %v217_v27 }
 0x1c9   :  { %355 = vmatmul.mubr.msk.f32.vlgmr.msra.gmra.mrb[2].mxu0 %vm143_vm3, %v218_v28 }
 0x29c   :  { %v297_v30 = vpop.f32.mrb[2].mxu0 }
 0x29d   :  { %v298_v31 = vadd.f32 %v297_v30, %v223_v29  ;;  %v356_v32 = vpop.f32.mrb[3].mxu0 }
 0x29f   :  { %302 = vst.msk [vmem:[%s491_s7] sm:$0xff] %vm301_vm4, %v298_v31 }
 0x2a0   :  { %307 = vsyncpa [#allocation3], 1 }

</bundles_post_ra>
